<compile_context>
chip_gen: v5e
topology: v5e:2x2
jax: 0.10.0
libtpu: 0.0.40
codegen_flags: <defaults>
</compile_context>

<pallas_src>
import jax
import jax.numpy as jnp
from jax.experimental import pallas as pl
from jax.experimental.pallas import tpu as pltpu


_LANES = 128       # vreg lane width: last dim must map here
_SUBLANES = 8      # (8, 128) tiling granularity
_TILE_ROWS = 512   # lane-dense tile for big maps: 512*128*4B = 256 KiB / buffer


# --------------------------------------------------------------------------- #
# Pallas kernel: fused affine transform of a standard-normal draw
# --------------------------------------------------------------------------- #
def _affine_kernel(loc_ref, scale_ref, z_ref, out_ref):
    # Pure VPU work, one pass over the tile.
    out_ref[...] = loc_ref[...] + scale_ref[...] * z_ref[...]


def _affine_sample_2d(loc2d, scale2d, z2d):
    """loc2d / scale2d / z2d: (rows, 128) float32, rows % 8 == 0."""
    n, d = loc2d.shape
    assert d == _LANES and n % _SUBLANES == 0

    if n <= _TILE_ROWS:
        # Whole problem fits in a few vregs: single step, full-array block,
        # no grid / per-step overhead, trivially within any generation's VMEM.
        return pl.pallas_call(
            _affine_kernel,
            out_shape=jax.ShapeDtypeStruct((n, d), jnp.float32),
            in_specs=[pl.BlockSpec((n, d), lambda: (0, 0))] * 3,
            out_specs=pl.BlockSpec((n, d), lambda: (0, 0)),
        )(loc2d, scale2d, z2d)

    # Large maps: big lane-dense tiles; tiles are independent so the axis is
    # "parallel" (megacore on v7x).  VMEM limit sized against v7x (64 MiB).
    assert n % _TILE_ROWS == 0
    grid = (n // _TILE_ROWS,)
    return pl.pallas_call(
        _affine_kernel,
        out_shape=jax.ShapeDtypeStruct((n, d), jnp.float32),
        grid=grid,
        in_specs=[pl.BlockSpec((_TILE_ROWS, d), lambda i: (i, 0))] * 3,
        out_specs=pl.BlockSpec((_TILE_ROWS, d), lambda i: (i, 0)),
        compiler_params=pltpu.CompilerParams(
            dimension_semantics=("parallel",),
            vmem_limit_bytes=32 * 1024 * 1024,
        ),
    )(loc2d, scale2d, z2d)


def _to_lane_dense(x, row_multiple):
    """Flatten x and pad so it reshapes to (rows, 128) with rows % row_multiple == 0."""
    flat = x.reshape(-1)
    total = flat.shape[0]
    block = row_multiple * _LANES
    pad = (-total) % block
    if pad:
        flat = jnp.pad(flat, (0, pad))
    return flat.reshape(-1, _LANES), total


# --------------------------------------------------------------------------- #
# Distribution object returned by RandomDistribution.forward()
# --------------------------------------------------------------------------- #
class PallasNormal:
    """Minimal Normal(loc, scale) whose .sample() runs the Pallas TPU kernel."""

    def __init__(self, loc, scale):
        loc = jnp.asarray(loc, jnp.float32)
        scale = jnp.broadcast_to(jnp.asarray(scale, jnp.float32), loc.shape)
        self.loc = loc
        self.scale = scale

    def sample(self, seed=0, key=None):
        if key is None:
            key = jax.random.PRNGKey(seed)
        shape = self.loc.shape

        total = 1
        for s in shape:
            total *= s
        rows_min = pl.cdiv(total, _LANES)
        row_multiple = _SUBLANES if rows_min <= _TILE_ROWS else _TILE_ROWS

        loc2d, _ = _to_lane_dense(self.loc, row_multiple)
        scale2d, _ = _to_lane_dense(self.scale, row_multiple)
        # Deterministic standard-normal draw per key; distinct keys give
        # distinct, non-overlapping streams (fixes the old per-tile seed reuse).
        z2d = jax.random.normal(key, loc2d.shape, dtype=jnp.float32)

        out2d = _affine_sample_2d(loc2d, scale2d, z2d)
        return out2d.reshape(-1)[:total].reshape(shape)


# --------------------------------------------------------------------------- #
# RandomDistribution: mirrors the nitorch module's forward() semantics
# (evaluate callable args/kwargs, then construct and return the distribution).
# --------------------------------------------------------------------------- #
class RandomDistribution:
    def __init__(self, distribution, *args, **kwargs):
        self.distribution = distribution
        self.args = args
        self.kwargs = kwargs

    def forward(self):
        args = list(self.args)
        kwargs = dict(self.kwargs)
        for i, value in enumerate(args):
            if callable(value):
                args[i] = value()
        for k, value in list(kwargs.items()):
            if callable(value):
                kwargs[k] = value()
        return self.distribution(*args, **kwargs)

    __call__ = forward


if __name__ == "__main__":
    key = jax.random.PRNGKey(0)
    k_loc, k_scale = jax.random.split(key)

    # Small NCHW parameter maps (batch=2, channels=4, spatial=16x16).
    loc = jax.random.normal(k_loc, (2, 4, 16, 16), dtype=jnp.float32)
    scale = 0.1 + jnp.abs(jax.random.normal(k_scale, (2, 4, 16, 16), dtype=jnp.float32))

    # Callable args get evaluated inside forward(), exactly like the torch module.
    module = RandomDistribution(PallasNormal, lambda: loc, scale=lambda: scale)
    dist = module.forward()          # forward() returns the distribution object
    sample = dist.sample(seed=0)     # hot path: Pallas fused sampling kernel

    sample = jax.block_until_ready(sample)
    assert sample.shape == (2, 4, 16, 16)
    assert sample.dtype == jnp.float32
    assert bool(jnp.all(jnp.isfinite(sample)))
    print("KERNEL_OK")
</pallas_src>

<mosaic_0001>
module attributes {stable_mosaic.version = 11 : i64} {
  func.func @_affine_kernel(%arg0: memref<16x128xf32, #tpu.memory_space<vmem>>, %arg1: memref<16x128xf32, #tpu.memory_space<vmem>>, %arg2: memref<16x128xf32, #tpu.memory_space<vmem>>, %arg3: memref<16x128xf32, #tpu.memory_space<vmem>>) attributes {dimension_semantics = [], scalar_prefetch = 0 : i64, scratch_operands = 0 : i64, tpu.core_type = #tpu.core_type<tc>} {
    %c0 = arith.constant 0 : index
    %c0_0 = arith.constant 0 : index
    %0 = vector.load %arg0[%c0, %c0_0] : memref<16x128xf32, #tpu.memory_space<vmem>>, vector<16x128xf32>
    %c0_1 = arith.constant 0 : index
    %c0_2 = arith.constant 0 : index
    %1 = vector.load %arg1[%c0_1, %c0_2] : memref<16x128xf32, #tpu.memory_space<vmem>>, vector<16x128xf32>
    %c0_3 = arith.constant 0 : index
    %c0_4 = arith.constant 0 : index
    %2 = vector.load %arg2[%c0_3, %c0_4] : memref<16x128xf32, #tpu.memory_space<vmem>>, vector<16x128xf32>
    %3 = arith.mulf %1, %2 : vector<16x128xf32>
    %4 = arith.addf %0, %3 : vector<16x128xf32>
    %c0_5 = arith.constant 0 : index
    %c0_6 = arith.constant 0 : index
    %5 = vector.load %arg3[%c0_5, %c0_6] : memref<16x128xf32, #tpu.memory_space<vmem>>, vector<16x128xf32>
    tpu.vector_store %arg3[%c0_5, %c0_6], %4 {strides = array<i32>} : memref<16x128xf32, #tpu.memory_space<vmem>>, vector<16x128xf32>,
    return
  }
}

</mosaic_0001>

<bundles_post_ra>
// kernel: tpu_custom_call.1
= control target key start
LH: loop header
LB: loop body
LE: loop exit
PB: predicated region body
PF: predicated region fallthrough
CT: control target
= control target key end

     0   :  { %8 = vsyncpa [#allocation3], 0  ;;  %s252_s0 = inlined_call_operand.hbm [shape: f32[16,128], index: 0, kind: input, shape index: {}]   ;;  %s253_s1 = inlined_call_operand.hbm [shape: f32[16,128], index: 1, kind: input, shape index: {}]   ;;  %s254_s2 = inlined_call_operand.hbm [shape: f32[16,128], index: 2, kind: input, shape index: {}]   ;;  %s255_s3 = inlined_call_operand.hbm [shape: f32[16,128], index: 3, kind: output, shape index: {}]  }
   0x1   :  { %9 = vsyncpa [#allocation6], 0 }
   0x2   :  { %10 = vsyncpa [#allocation4], 0  ;;  %s28_s14 = sshll.u32 %s253_s1, 4  ;;  %s202_s15 = smov [#allocation5]   ;;  %s29_s14 = int_to_ptr.hbm [resolvable:$true] %s28_s14 }
   0x3   :  { %s30_s16 = sshll.u32 %s202_s15, 4  ;;  %s15_s19 = sshll.u32 %s252_s0, 4  ;;  %s31_s16 = int_to_ptr.vmem [resolvable:$true] %s30_s16  ;;  %s16_s19 = int_to_ptr.hbm [resolvable:$true] %s15_s19 }
   0x4   :  { %s203_s20 = smov 128   ;;  %s204_s21 = smov 8  }
   0x5   :  { %36 = dma.hbm_to_vmem [thread:$0]  %s29_s14, 256, %s31_s16, [#allocation6], %s203_s20, %s203_s20, %s204_s21  }
   0x6   :  { %s205_s22 = smov [#allocation2]   ;;  %s41_s1 = sshll.u32 %s254_s2, 4  ;;  %s42_s1 = int_to_ptr.hbm [resolvable:$true] %s41_s1 }
   0x7   :  { %s17_s23 = sshll.u32 %s205_s22, 4  ;;  %s206_s0 = smov [#allocation7]   ;;  %s18_s23 = int_to_ptr.vmem [resolvable:$true] %s17_s23 }
   0x8   :  { %23 = dma.hbm_to_vmem [thread:$0]  %s16_s19, 256, %s18_s23, [#allocation3], %s203_s20, %s203_s20, %s204_s21  }
   0x9   :  { %s43_s26 = sshll.u32 %s206_s0, 4  ;;  %s44_s26 = int_to_ptr.vmem [resolvable:$true] %s43_s26 }
   0xa   :  { %49 = dma.hbm_to_vmem [thread:$0]  %s42_s1, 256, %s44_s26, [#allocation6], %s203_s20, %s203_s20, %s204_s21  }
   0xb   :  { %196 = dma.done.wait [#allocation3], 256  }
   0xc   :  { %197 = vsyncadd [#allocation3], 4294967040 }
   0xd   :  { %198 = dma.done.wait [#allocation6], 512  }
   0xe   :  { %199 = vsyncadd [#allocation6], 4294966784  ;;  %v62_v0 = vld [vmem:[#allocation2] sm:$0xff]  ;;  %v64_v1 = vld [vmem:[#allocation5] sm:$0xff]  ;;  %s207_s2 = smov [#allocation8]   ;;  %s80_s30 = sshll.u32 %s255_s3, 4  ;;  %s81_s30 = int_to_ptr.hbm [resolvable:$true] %s80_s30 }
   0xf   :  { %v66_v2 = vld [vmem:[#allocation7] sm:$0xff]  ;;  %v63_v4 = vld [vmem:[#allocation2 + $0x8] sm:$0xff]  ;;  %v65_v5 = vld [vmem:[#allocation5 + $0x8] sm:$0xff]  ;;  %s78_s27 = sshll.u32 %s207_s2, 4  ;;  %s79_s27 = int_to_ptr.vmem [resolvable:$true] %s78_s27 }
  0x10   :  { %v68_v3 = vmul.f32 %v66_v2, %v64_v1  ;;  %v67_v6 = vld [vmem:[#allocation7 + $0x8] sm:$0xff] }
  0x11   :  { %v69_v7 = vmul.f32 %v67_v6, %v65_v5 }
  0x12   :  { %v70_v8 = vadd.f32 %v68_v3, %v62_v0 }
  0x13   :  { %v71_v9 = vadd.f32 %v69_v7, %v63_v4 }
  0x14   :  { %72 = vst [vmem:[#allocation8] sm:$0xff] %v70_v8 }
  0x15   :  { %73 = vst [vmem:[#allocation8 + $0x8] sm:$0xff] %v71_v9 }
  0x16   :  { %86 = dma.vmem_to_hbm [thread:$0]  %s79_s27, 256, %s81_s30, [#allocation4], %s203_s20, %s203_s20, %s204_s21  }
  0x17   :  { %200 = dma.done.wait [#allocation4], 256  }
  0x18   :  { %201 = vsyncadd [#allocation4], 4294967040 }
  0x19   :  { %91 = vsyncpa [#allocation3], 1 }
  0x1a   :  { %92 = vsyncpa [#allocation6], 1 }
  0x1b   :  { %93 = vsyncpa [#allocation4], 1 }

</bundles_post_ra>
